<compile_context>
chip_gen: v6e
topology: v6e:2x2x1
jax: 0.10.0
libtpu: 0.0.40
codegen_flags: <defaults>
</compile_context>

<pallas_src>
import jax
import jax.numpy as jnp
from jax.experimental import pallas as pl
from jax.experimental.pallas import tpu as pltpu

LANE = 128     # TPU lane width / padded feature dim
SUBLANE = 8    # f32 sublane count


def _round_up(n, m):
    return ((n + m - 1) // m) * m


def dqn_mlp_kernel(x_ref,
                   w1_ref, b1_ref,
                   w2_ref, b2_ref,
                   w3_ref, b3_ref,
                   wq_ref, bq_ref,
                   out_ref):
    # x tile: (TILE_B, state_dim) f32 -> bf16 for the MXU.
    h = x_ref[...].astype(jnp.bfloat16)

    h = jnp.dot(h, w1_ref[...], preferred_element_type=jnp.float32)
    h = jnp.maximum(h + b1_ref[...], 0.0).astype(jnp.bfloat16)      # (TILE_B, 128)

    h = jnp.dot(h, w2_ref[...], preferred_element_type=jnp.float32)
    h = jnp.maximum(h + b2_ref[...], 0.0).astype(jnp.bfloat16)      # (TILE_B, 128)

    h = jnp.dot(h, w3_ref[...], preferred_element_type=jnp.float32)
    h = jnp.maximum(h + b3_ref[...], 0.0).astype(jnp.bfloat16)      # (TILE_B, 128)

    q = jnp.dot(h, wq_ref[...], preferred_element_type=jnp.float32)
    out_ref[...] = q + bq_ref[...]                                  # (TILE_B, 128) f32


def dqn_forward(x, padded_params, n_actions):
    """x: (B, state_dim) f32 -> q-values (B, n_actions) f32."""
    (w1, b1), (w2, b2), (w3, b3), (wq, bq) = padded_params
    B, state_dim = x.shape

    # Batch tile: 256 rows fills the M axis of the v6e/v7x 256-wide MXU and is
    # 2x128 passes on v5e; tiny batches just get padded to one sublane-aligned
    # tile.  ~52 KB of bf16 params + <1 MiB of activation tiles -> well under
    # the 32 MiB default scoped VMEM on every generation (incl. v7x's 64 MiB).
    tile_b = 256 if B >= 256 else _round_up(max(B, SUBLANE), SUBLANE)
    b_pad = _round_up(B, tile_b)
    if b_pad != B:
        x = jnp.pad(x, ((0, b_pad - B), (0, 0)))

    grid = (b_pad // tile_b,)

    x_spec = pl.BlockSpec((tile_b, state_dim), lambda i: (i, 0))
    # Weights/biases: full-array blocks with a constant index_map -> loaded
    # once and held VMEM-resident across all batch tiles.
    const = lambda a: pl.BlockSpec(a.shape, lambda i: (0,) * a.ndim)

    out = pl.pallas_call(
        dqn_mlp_kernel,
        out_shape=jax.ShapeDtypeStruct((b_pad, LANE), jnp.float32),
        grid=grid,
        in_specs=[x_spec,
                  const(w1), const(b1),
                  const(w2), const(b2),
                  const(w3), const(b3),
                  const(wq), const(bq)],
        out_specs=pl.BlockSpec((tile_b, LANE), lambda i: (i, 0)),
        compiler_params=pltpu.CompilerParams(
            dimension_semantics=("parallel",)),
    )(x, w1, b1, w2, b2, w3, b3, wq, bq)

    # Slice padded rows / padded q columns back off BEFORE any argmax/max over
    # actions (padded columns are exactly 0 and could otherwise win the argmax).
    return out[:B, :n_actions]


# ----------------------------------------------------------------------------
# Parameter construction (PyTorch nn.Linear-style init) + padding/bf16 prep.
# ----------------------------------------------------------------------------

def init_linear(key, fan_in, fan_out):
    """Deterministic PyTorch-style nn.Linear init: U(-1/sqrt(fan_in), +...)."""
    kw, kb = jax.random.split(key)
    bound = 1.0 / jnp.sqrt(float(fan_in))
    # stored as (in, out) == torch_weight.T
    w = jax.random.uniform(kw, (fan_in, fan_out), jnp.float32, -bound, bound)
    b = jax.random.uniform(kb, (1, fan_out), jnp.float32, -bound, bound)
    return w, b


def make_params(state_dim, n_actions, key):
    k1, k2, k3, k4 = jax.random.split(key, 4)
    return (init_linear(k1, state_dim, 64),
            init_linear(k2, 64, 128),
            init_linear(k3, 128, 32),
            init_linear(k4, 32, n_actions))


def pad_params(params):
    """Zero-pad hidden/output feature dims to 128 lanes; weights -> bf16,
    biases stay f32 (bias+ReLU runs in f32 on the VPU).  Zero padding keeps the
    math exact: padded hidden units are relu(0 + 0) = 0 and contribute nothing."""
    def pad_wb(w, b, pad_in, pad_out):
        fi, fo = w.shape
        w = jnp.pad(w, ((0, pad_in - fi), (0, pad_out - fo))).astype(jnp.bfloat16)
        b = jnp.pad(b, ((0, 0), (0, pad_out - b.shape[1]))).astype(jnp.float32)
        return w, b

    (w1, b1), (w2, b2), (w3, b3), (wq, bq) = params
    state_dim = w1.shape[0]
    return (pad_wb(w1, b1, state_dim, LANE),
            pad_wb(w2, b2, LANE, LANE),
            pad_wb(w3, b3, LANE, LANE),
            pad_wb(wq, bq, LANE, LANE))


# ----------------------------------------------------------------------------
# Pure-JAX references.
# ----------------------------------------------------------------------------

def reference_forward_f32(x, params):
    (w1, b1), (w2, b2), (w3, b3), (wq, bq) = params
    h = jnp.maximum(x @ w1 + b1, 0.0)
    h = jnp.maximum(h @ w2 + b2, 0.0)
    h = jnp.maximum(h @ w3 + b3, 0.0)
    return h @ wq + bq


def reference_forward_bf16(x, padded_params, n_actions):
    """Same bf16-weight / f32-accumulate recipe as the kernel, in plain XLA."""
    (w1, b1), (w2, b2), (w3, b3), (wq, bq) = padded_params
    h = x.astype(jnp.bfloat16)
    h = jnp.maximum(jnp.dot(h, w1, preferred_element_type=jnp.float32) + b1,
                    0.0).astype(jnp.bfloat16)
    h = jnp.maximum(jnp.dot(h, w2, preferred_element_type=jnp.float32) + b2,
                    0.0).astype(jnp.bfloat16)
    h = jnp.maximum(jnp.dot(h, w3, preferred_element_type=jnp.float32) + b3,
                    0.0).astype(jnp.bfloat16)
    q = jnp.dot(h, wq, preferred_element_type=jnp.float32) + bq
    return q[:, :n_actions]


if __name__ == "__main__":
    key = jax.random.PRNGKey(0)
    k_params, k_x, k_big = jax.random.split(key, 3)

    state_dim = 8        # state_shape = (8,)
    n_actions = 4
    batch = 2

    params = make_params(state_dim, n_actions, k_params)
    padded = pad_params(params)
    x = jax.random.normal(k_x, (batch, state_dim), jnp.float32)

    # Small (agent-step sized) call.
    q = jax.block_until_ready(dqn_forward(x, padded, n_actions))
    assert q.shape == (batch, n_actions)

    q_bf16_ref = reference_forward_bf16(x, padded, n_actions)
    assert jnp.allclose(q, q_bf16_ref, atol=5e-3, rtol=5e-3), \
        "mismatch vs bf16 reference"

    q_f32_ref = reference_forward_f32(x, params)
    assert jnp.allclose(q, q_f32_ref, atol=5e-2, rtol=5e-2), \
        "mismatch vs f32 reference"

    # Larger (replay-minibatch sized) call exercising the batch-tiled grid.
    x_big = jax.random.normal(k_big, (512, state_dim), jnp.float32)
    q_big = jax.block_until_ready(dqn_forward(x_big, padded, n_actions))
    assert q_big.shape == (512, n_actions)
    q_big_ref = reference_forward_bf16(x_big, padded, n_actions)
    assert jnp.allclose(q_big, q_big_ref, atol=5e-3, rtol=5e-3), \
        "mismatch vs bf16 reference (batched)"

    # TODO(synk): epsilon-greedy sample_actions / get_qvalues numpy-RNG glue is
    # host-side logic with no Pallas equivalent; only forward() is kernelized.
    print("KERNEL_OK")
</pallas_src>

<mosaic_0001>
module attributes {stable_mosaic.version = 11 : i64} {
  func.func @dqn_mlp_kernel(%arg0: i32, %arg1: memref<8x8xf32, #tpu.memory_space<vmem>>, %arg2: memref<8x128xbf16, #tpu.memory_space<vmem>>, %arg3: memref<1x128xf32, #tpu.memory_space<vmem>>, %arg4: memref<128x128xbf16, #tpu.memory_space<vmem>>, %arg5: memref<1x128xf32, #tpu.memory_space<vmem>>, %arg6: memref<128x128xbf16, #tpu.memory_space<vmem>>, %arg7: memref<1x128xf32, #tpu.memory_space<vmem>>, %arg8: memref<128x128xbf16, #tpu.memory_space<vmem>>, %arg9: memref<1x128xf32, #tpu.memory_space<vmem>>, %arg10: memref<8x128xf32, #tpu.memory_space<vmem>>) attributes {dimension_semantics = [#tpu.dimension_semantics<parallel>], iteration_bounds = array<i64: 1>, scalar_prefetch = 0 : i64, scratch_operands = 0 : i64, tpu.core_type = #tpu.core_type<tc>, window_params = [{transform_indices = @transform_0, window_bounds = array<i64: 8, 8>}, {pipeline_mode = #tpu.pipeline_mode<synchronous>, transform_indices = @transform_1, window_bounds = array<i64: 8, 128>}, {pipeline_mode = #tpu.pipeline_mode<synchronous>, transform_indices = @transform_2, window_bounds = array<i64: 1, 128>}, {pipeline_mode = #tpu.pipeline_mode<synchronous>, transform_indices = @transform_3, window_bounds = array<i64: 128, 128>}, {pipeline_mode = #tpu.pipeline_mode<synchronous>, transform_indices = @transform_4, window_bounds = array<i64: 1, 128>}, {pipeline_mode = #tpu.pipeline_mode<synchronous>, transform_indices = @transform_5, window_bounds = array<i64: 128, 128>}, {pipeline_mode = #tpu.pipeline_mode<synchronous>, transform_indices = @transform_6, window_bounds = array<i64: 1, 128>}, {pipeline_mode = #tpu.pipeline_mode<synchronous>, transform_indices = @transform_7, window_bounds = array<i64: 128, 128>}, {pipeline_mode = #tpu.pipeline_mode<synchronous>, transform_indices = @transform_8, window_bounds = array<i64: 1, 128>}, {transform_indices = @transform_9, window_bounds = array<i64: 8, 128>}]} {
    %c0 = arith.constant 0 : index
    %c0_0 = arith.constant 0 : index
    %0 = vector.load %arg1[%c0, %c0_0] : memref<8x8xf32, #tpu.memory_space<vmem>>, vector<8x8xf32>
    %1 = arith.truncf %0 : vector<8x8xf32> to vector<8x8xbf16>
    %c0_1 = arith.constant 0 : index
    %c0_2 = arith.constant 0 : index
    %2 = vector.load %arg2[%c0_1, %c0_2] : memref<8x128xbf16, #tpu.memory_space<vmem>>, vector<8x128xbf16>
    %cst = arith.constant dense<0.000000e+00> : vector<8x128xf32>
    %3 = tpu.matmul %1, %2, %cst {dimension_numbers = #tpu.dot_dimension_numbers<[1], [0], [0], [1], [0, 0, 1, 1], [], []>} : vector<8x8xbf16>, vector<8x128xbf16>, vector<8x128xf32> -> vector<8x128xf32>
    %c0_3 = arith.constant 0 : index
    %c0_4 = arith.constant 0 : index
    %4 = vector.load %arg3[%c0_3, %c0_4] : memref<1x128xf32, #tpu.memory_space<vmem>>, vector<1x128xf32>
    %5 = vector.broadcast %4 : vector<1x128xf32> to vector<8x128xf32>
    %6 = arith.addf %3, %5 : vector<8x128xf32>
    %cst_5 = arith.constant 0.000000e+00 : f32
    %7 = vector.broadcast %cst_5 : f32 to vector<8x128xf32>
    %8 = arith.maximumf %6, %7 : vector<8x128xf32>
    %9 = arith.truncf %8 : vector<8x128xf32> to vector<8x128xbf16>
    %c0_6 = arith.constant 0 : index
    %c0_7 = arith.constant 0 : index
    %10 = vector.load %arg4[%c0_6, %c0_7] : memref<128x128xbf16, #tpu.memory_space<vmem>>, vector<128x128xbf16>
    %cst_8 = arith.constant dense<0.000000e+00> : vector<8x128xf32>
    %11 = tpu.matmul %9, %10, %cst_8 {dimension_numbers = #tpu.dot_dimension_numbers<[1], [0], [0], [1], [0, 0, 1, 1], [], []>} : vector<8x128xbf16>, vector<128x128xbf16>, vector<8x128xf32> -> vector<8x128xf32>
    %c0_9 = arith.constant 0 : index
    %c0_10 = arith.constant 0 : index
    %12 = vector.load %arg5[%c0_9, %c0_10] : memref<1x128xf32, #tpu.memory_space<vmem>>, vector<1x128xf32>
    %13 = vector.broadcast %12 : vector<1x128xf32> to vector<8x128xf32>
    %14 = arith.addf %11, %13 : vector<8x128xf32>
    %cst_11 = arith.constant 0.000000e+00 : f32
    %15 = vector.broadcast %cst_11 : f32 to vector<8x128xf32>
    %16 = arith.maximumf %14, %15 : vector<8x128xf32>
    %17 = arith.truncf %16 : vector<8x128xf32> to vector<8x128xbf16>
    %c0_12 = arith.constant 0 : index
    %c0_13 = arith.constant 0 : index
    %18 = vector.load %arg6[%c0_12, %c0_13] : memref<128x128xbf16, #tpu.memory_space<vmem>>, vector<128x128xbf16>
    %cst_14 = arith.constant dense<0.000000e+00> : vector<8x128xf32>
    %19 = tpu.matmul %17, %18, %cst_14 {dimension_numbers = #tpu.dot_dimension_numbers<[1], [0], [0], [1], [0, 0, 1, 1], [], []>} : vector<8x128xbf16>, vector<128x128xbf16>, vector<8x128xf32> -> vector<8x128xf32>
    %c0_15 = arith.constant 0 : index
    %c0_16 = arith.constant 0 : index
    %20 = vector.load %arg7[%c0_15, %c0_16] : memref<1x128xf32, #tpu.memory_space<vmem>>, vector<1x128xf32>
    %21 = vector.broadcast %20 : vector<1x128xf32> to vector<8x128xf32>
    %22 = arith.addf %19, %21 : vector<8x128xf32>
    %cst_17 = arith.constant 0.000000e+00 : f32
    %23 = vector.broadcast %cst_17 : f32 to vector<8x128xf32>
    %24 = arith.maximumf %22, %23 : vector<8x128xf32>
    %25 = arith.truncf %24 : vector<8x128xf32> to vector<8x128xbf16>
    %c0_18 = arith.constant 0 : index
    %c0_19 = arith.constant 0 : index
    %26 = vector.load %arg8[%c0_18, %c0_19] : memref<128x128xbf16, #tpu.memory_space<vmem>>, vector<128x128xbf16>
    %cst_20 = arith.constant dense<0.000000e+00> : vector<8x128xf32>
    %27 = tpu.matmul %25, %26, %cst_20 {dimension_numbers = #tpu.dot_dimension_numbers<[1], [0], [0], [1], [0, 0, 1, 1], [], []>} : vector<8x128xbf16>, vector<128x128xbf16>, vector<8x128xf32> -> vector<8x128xf32>
    %c0_21 = arith.constant 0 : index
    %c0_22 = arith.constant 0 : index
    %28 = vector.load %arg9[%c0_21, %c0_22] : memref<1x128xf32, #tpu.memory_space<vmem>>, vector<1x128xf32>
    %29 = vector.broadcast %28 : vector<1x128xf32> to vector<8x128xf32>
    %30 = arith.addf %27, %29 : vector<8x128xf32>
    %c0_23 = arith.constant 0 : index
    %c0_24 = arith.constant 0 : index
    %31 = vector.load %arg10[%c0_23, %c0_24] : memref<8x128xf32, #tpu.memory_space<vmem>>, vector<8x128xf32>
    tpu.vector_store %arg10[%c0_23, %c0_24], %30 {strides = array<i32>} : memref<8x128xf32, #tpu.memory_space<vmem>>, vector<8x128xf32>,
    return
  }
  func.func @transform_0(%arg0: i32) -> (i32, i32) {
    %c0_i32 = arith.constant 0 : i32
    %c0_i32_0 = arith.constant 0 : i32
    return %arg0, %c0_i32 : i32, i32
  }
  func.func @transform_1(%arg0: i32) -> (i32, i32) {
    %c0_i32 = arith.constant 0 : i32
    %c0_i32_0 = arith.constant 0 : i32
    %c0_i32_1 = arith.constant 0 : i32
    return %c0_i32, %c0_i32_0 : i32, i32
  }
  func.func @transform_2(%arg0: i32) -> (i32, i32) {
    %c0_i32 = arith.constant 0 : i32
    %c0_i32_0 = arith.constant 0 : i32
    %c0_i32_1 = arith.constant 0 : i32
    return %c0_i32, %c0_i32_0 : i32, i32
  }
  func.func @transform_3(%arg0: i32) -> (i32, i32) {
    %c0_i32 = arith.constant 0 : i32
    %c0_i32_0 = arith.constant 0 : i32
    %c0_i32_1 = arith.constant 0 : i32
    return %c0_i32, %c0_i32_0 : i32, i32
  }
  func.func @transform_4(%arg0: i32) -> (i32, i32) {
    %c0_i32 = arith.constant 0 : i32
    %c0_i32_0 = arith.constant 0 : i32
    %c0_i32_1 = arith.constant 0 : i32
    return %c0_i32, %c0_i32_0 : i32, i32
  }
  func.func @transform_5(%arg0: i32) -> (i32, i32) {
    %c0_i32 = arith.constant 0 : i32
    %c0_i32_0 = arith.constant 0 : i32
    %c0_i32_1 = arith.constant 0 : i32
    return %c0_i32, %c0_i32_0 : i32, i32
  }
  func.func @transform_6(%arg0: i32) -> (i32, i32) {
    %c0_i32 = arith.constant 0 : i32
    %c0_i32_0 = arith.constant 0 : i32
    %c0_i32_1 = arith.constant 0 : i32
    return %c0_i32, %c0_i32_0 : i32, i32
  }
  func.func @transform_7(%arg0: i32) -> (i32, i32) {
    %c0_i32 = arith.constant 0 : i32
    %c0_i32_0 = arith.constant 0 : i32
    %c0_i32_1 = arith.constant 0 : i32
    return %c0_i32, %c0_i32_0 : i32, i32
  }
  func.func @transform_8(%arg0: i32) -> (i32, i32) {
    %c0_i32 = arith.constant 0 : i32
    %c0_i32_0 = arith.constant 0 : i32
    %c0_i32_1 = arith.constant 0 : i32
    return %c0_i32, %c0_i32_0 : i32, i32
  }
  func.func @transform_9(%arg0: i32) -> (i32, i32) {
    %c0_i32 = arith.constant 0 : i32
    %c0_i32_0 = arith.constant 0 : i32
    return %arg0, %c0_i32 : i32, i32
  }
}

</mosaic_0001>

<bundles_post_ra>
// kernel: tpu_custom_call.1
= control target key start
LH: loop header
LB: loop body
LE: loop exit
PB: predicated region body
PF: predicated region fallthrough
CT: control target
= control target key end

     0   :  { %14 = vsyncpa [#allocation3], 0  ;;  %s931_s0 = inlined_call_operand.hbm [shape: f32[8,8], index: 0, kind: input, shape index: {}]   ;;  %s932_s1 = inlined_call_operand.hbm [shape: bf16[8,128], index: 1, kind: input, shape index: {}]   ;;  %s933_s2 = inlined_call_operand.vmem [shape: f32[1,128], index: 2, kind: input, shape index: {}]   ;;  %s934_s3 = inlined_call_operand.hbm [shape: bf16[128,128], index: 3, kind: input, shape index: {}]   ;;  %s935_s4 = inlined_call_operand.vmem [shape: f32[1,128], index: 4, kind: input, shape index: {}]   ;;  %s936_s5 = inlined_call_operand.hbm [shape: bf16[128,128], index: 5, kind: input, shape index: {}]   ;;  %s937_s6 = inlined_call_operand.vmem [shape: f32[1,128], index: 6, kind: input, shape index: {}]   ;;  %s938_s7 = inlined_call_operand.hbm [shape: bf16[128,128], index: 7, kind: input, shape index: {}]   ;;  %s939_s8 = inlined_call_operand.vmem [shape: f32[1,128], index: 8, kind: input, shape index: {}]   ;;  %s940_s9 = inlined_call_operand.hbm [shape: f32[8,128], index: 9, kind: output, shape index: {}]  }
   0x1   :  { %15 = vsyncpa [#allocation6], 0 }
   0x2   :  { %16 = vsyncpa [#allocation9], 0 }
   0x3   :  { %17 = vsyncpa [#allocation4], 0  ;;  %s799_s30 = smov [#allocation5]  }
   0x4   :  { %s34_s10 = sshll.u32 %s799_s30, 4  ;;  %s35_s10 = int_to_ptr.vmem [resolvable:$true] %s34_s10 }
   0x5   :  { %s679_s11 = scalar_lea.vmem %s35_s10, 64  ;;  %p684_p1 = scmp.lt.s32.totalorder %s35_s10, %s35_s10 }
   0x6   :  { %p680_p0 = scmp.ne.s32.totalorder %s35_s10, %s679_s11  ;;  %p685_p2 = scmp.lt.s32.totalorder %s679_s11, %s679_s11 }
   0x8   :  { %p686_p3 = por %p685_p2, %p684_p1 }
   0xa   :  { %p687_p4 = pnand %p686_p3, %p680_p0 }
   0xc   :  { %690 = shalt.err (!%p687_p4)
}
   0xd   :  { %37 = dma.hbm_to_vmem [thread:$0]  %s932_s1, 64, %s35_s10, [#allocation6]  }
   0xe   :  { %s800_s14 = smov [#allocation8]   ;;  %s801_s16 = smov [#allocation2]  }
   0xf   :  { %s59_s15 = sshll.u32 %s800_s14, 4  ;;  %s24_s17 = sshll.u32 %s801_s16, 4  ;;  %s60_s15 = int_to_ptr.vmem [resolvable:$true] %s59_s15  ;;  %s25_s17 = int_to_ptr.vmem [resolvable:$true] %s24_s17 }
  0x10   :  { %s699_s18 = scalar_lea.vmem %s60_s15, 1024  ;;  %p704_p6 = scmp.lt.s32.totalorder %s60_s15, %s60_s15 }
  0x11   :  { %p700_p5 = scmp.ne.s32.totalorder %s60_s15, %s699_s18  ;;  %p705_p7 = scmp.lt.s32.totalorder %s699_s18, %s699_s18 }
  0x13   :  { %p706_p8 = por %p705_p7, %p704_p6 }
  0x15   :  { %p707_p9 = pnand %p706_p8, %p700_p5 }
  0x17   :  { %710 = shalt.err (!%p707_p9)
}
  0x18   :  { %s802_s19 = smov 64   ;;  %s803_s20 = smov 4  }
  0x19   :  { %65 = dma.hbm_to_vmem [thread:$0]  %s936_s5, 1024, %s60_s15, [#allocation9], %s802_s19, %s802_s19, %s803_s20  }
  0x1a   :  { %s719_s1 = scalar_lea.vmem %s25_s17, 128  ;;  %p724_p11 = scmp.lt.s32.totalorder %s25_s17, %s25_s17 }
  0x1b   :  { %p720_p10 = scmp.ne.s32.totalorder %s25_s17, %s719_s1  ;;  %p725_p12 = scmp.lt.s32.totalorder %s719_s1, %s719_s1 }
  0x1d   :  { %p726_p13 = por %p725_p12, %p724_p11 }
  0x1f   :  { %p727_p0 = pnand %p726_p13, %p720_p10 }
  0x21   :  { %730 = shalt.err (!%p727_p0)
}
  0x22   :  { %27 = dma.hbm_to_vmem [thread:$0]  %s931_s0, 128, %s25_s17, [#allocation3]  }
  0x23   :  { %s804_s25 = smov [#allocation7]   ;;  %s805_s27 = smov [#allocation10]  }
  0x24   :  { %s45_s26 = sshll.u32 %s804_s25, 4  ;;  %s73_s28 = sshll.u32 %s805_s27, 4  ;;  %s46_s26 = int_to_ptr.vmem [resolvable:$true] %s45_s26  ;;  %s74_s28 = int_to_ptr.vmem [resolvable:$true] %s73_s28 }
  0x25   :  { %s739_s29 = scalar_lea.vmem %s46_s26, 1024  ;;  %p744_p2 = scmp.lt.s32.totalorder %s46_s26, %s46_s26 }
  0x26   :  { %p740_p1 = scmp.ne.s32.totalorder %s46_s26, %s739_s29  ;;  %p745_p3 = scmp.lt.s32.totalorder %s739_s29, %s739_s29 }
  0x28   :  { %p746_p4 = por %p745_p3, %p744_p2 }
  0x2a   :  { %p747_p5 = pnand %p746_p4, %p740_p1 }
  0x2c   :  { %750 = shalt.err (!%p747_p5)
}
  0x2d   :  { %51 = dma.hbm_to_vmem [thread:$0]  %s934_s3, 1024, %s46_s26, [#allocation6], %s802_s19, %s802_s19, %s803_s20  }
  0x2e   :  { %s759_s0 = scalar_lea.vmem %s74_s28, 1024  ;;  %p764_p7 = scmp.lt.s32.totalorder %s74_s28, %s74_s28 }
  0x2f   :  { %p760_p6 = scmp.ne.s32.totalorder %s74_s28, %s759_s0  ;;  %p765_p8 = scmp.lt.s32.totalorder %s759_s0, %s759_s0 }
  0x31   :  { %p766_p9 = por %p765_p8, %p764_p7 }
  0x33   :  { %p767_p10 = pnand %p766_p9, %p760_p6 }
  0x35   :  { %770 = shalt.err (!%p767_p10)
}
  0x36   :  { %79 = dma.hbm_to_vmem [thread:$0]  %s938_s7, 1024, %s74_s28, [#allocation9], %s802_s19, %s802_s19, %s803_s20  }
  0x37   :  { %791 = dma.done.wait [#allocation3], 128  }
  0x38   :  { %792 = vsyncadd [#allocation3], 4294967168 }
  0x39   :  { %793 = dma.done.wait [#allocation6], 1088  }
  0x3a   :  { %794 = vsyncadd [#allocation6], 4294966208 }
  0x3b   :  { %795 = dma.done.wait [#allocation9], 2048  }
  0x3c   :  { %796 = vsyncadd [#allocation9], 4294965248  ;;  %v806_v0 = vmov 0.0   ;;  %vm807_vm0 = vmmov 0   ;;  %vm112_vm1 = vcmask 1043456   ;;  %v98_v2 = vld [vmem:[#allocation2] sm:$0xff] }
  0x3d   :  { %571 = vmatprep.subr.bf16.mxu0 %v806_v0  ;;  %573 = vmatprep.mubr.msk.bf16.mxu0 %vm807_vm0, %v806_v0  ;;  %v100_v1 = vld [vmem:[#allocation5] sm:$0xf]  ;;  %v99_v4 = vpack.c.bf16 %v98_v2, %v98_v2  ;;  %vm108_vm2 = vcmask 64512   ;;  %v648_v6 = vld [vmem:[#allocation7 + $0x30] sm:$0xff]   ;;  %v649_v7 = vld [vmem:[#allocation7 + $0x28] sm:$0xff]   ;;  %s808_s16 = smov [#allocation11]  }
  0x3e   :  { %577 = vmatprep.subr.bf16.mxu1 %v806_v0  ;;  %593 = vmatprep.mubr.msk.bf16.mxu1 %vm807_vm0, %v806_v0  ;;  %v114_v3 = vsel %vm112_vm1, %v100_v1, 0  ;;  %v647_v5 = vld [vmem:[#allocation7 + $0x38] sm:$0xff]   ;;  %v650_v8 = vld [vmem:[#allocation7 + $0x20] sm:$0xff]   ;;  %v652_v10 = vld [vmem:[#allocation7 + $0x10] sm:$0xff]   ;;  %s502_s17 = sshll.u32 %s808_s16, 4  ;;  %s503_s17 = int_to_ptr.vmem [resolvable:$true] %s502_s17 }
  0x3f   :  { %572 = vmatpush3.bf16.msra.mxu0 %v114_v3  ;;  %578 = vmatpush3.bf16.msra.mxu1 %v647_v5  ;;  %v651_v9 = vld [vmem:[#allocation7 + $0x18] sm:$0xff]   ;;  %v653_v11 = vld [vmem:[#allocation7 + $0x8] sm:$0xff]   ;;  %v654_v12 = vld [vmem:[#allocation7] sm:$0xff]   ;;  %p776_p12 = scmp.lt.s32.totalorder %s503_s17, %s503_s17 }
  0x40   :  { %597 = vmatprep.subr.bf16.mxu0 %v806_v0  ;;  %579 = vmatprep.subr.bf16.mxu1 %v806_v0  ;;  %v655_v13 = vld [vmem:[#allocation8 + $0x38] sm:$0xff]   ;;  %v656_v14 = vld [vmem:[#allocation8 + $0x30] sm:$0xff]   ;;  %v657_v15 = vld [vmem:[#allocation8 + $0x28] sm:$0xff]  }
  0x41   :  { %v658_v16 = vld [vmem:[#allocation8 + $0x20] sm:$0xff]   ;;  %v659_v17 = vld [vmem:[#allocation8 + $0x18] sm:$0xff]   ;;  %v660_v18 = vld [vmem:[#allocation8 + $0x10] sm:$0xff]  }
  0x42   :  { %574 = vmatmul.mubr.msk.bf16.vlgmr.msra.gmra.mxu0 %vm108_vm2, %v99_v4  ;;  %v513_v19 = vld [vmem:[%s933_s2] ss:$0 sm:$0xff]  ;;  %v661_v27 = vld [vmem:[#allocation8 + $0x8] sm:$0xff]   ;;  %v662_v28 = vld [vmem:[#allocation8] sm:$0xff]  }
  0x43   :  { %613 = vmatprep.mubr.msk.bf16.mxu0 %vm807_vm0, %v806_v0  ;;  %580 = vmatpush3.bf16.msra.mxu1 %v648_v6  ;;  %v663_v29 = vld [vmem:[#allocation10 + $0x38] sm:$0xff]   ;;  %v664_v30 = vld [vmem:[#allocation10 + $0x30] sm:$0xff]   ;;  %v665_v31 = vld [vmem:[#allocation10 + $0x28] sm:$0xff]  }
  0x44   :  { %581 = vmatprep.subr.bf16.mxu1 %v806_v0  ;;  %598 = vmatpush3.bf16.msra.mxu0 %v655_v13  ;;  %v666_v32 = vld [vmem:[#allocation10 + $0x20] sm:$0xff]   ;;  %v667_v33 = vld [vmem:[#allocation10 + $0x18] sm:$0xff]   ;;  %v668_v34 = vld [vmem:[#allocation10 + $0x10] sm:$0xff]  }
  0x45   :  { %599 = vmatprep.subr.bf16.mxu0 %v806_v0  ;;  %v515_v35 = vld [vmem:[%s935_s4] ss:$0 sm:$0xff]  ;;  %v669_v43 = vld [vmem:[#allocation10 + $0x8] sm:$0xff]   ;;  %v670_v44 = vld [vmem:[#allocation10] sm:$0xff]  }
  0x46   :  { %v524_v45 = vld [vmem:[%s937_s6] ss:$0 sm:$0xff]  ;;  %s771_s6 = scalar_lea.vmem %s503_s17, 128 }
  0x47   :  { %582 = vmatpush3.bf16.msra.mxu1 %v649_v7  ;;  %v533_v53 = vld [vmem:[%s939_s8] ss:$0 sm:$0xff]  ;;  %p772_p11 = scmp.ne.s32.totalorder %s503_s17, %s771_s6  ;;  %p777_p13 = scmp.lt.s32.totalorder %s771_s6, %s771_s6 }
  0x48   :  { %583 = vmatprep.subr.bf16.mxu1 %v806_v0  ;;  %600 = vmatpush3.bf16.msra.mxu0 %v656_v14 }
  0x49   :  { %601 = vmatprep.subr.bf16.mxu0 %v806_v0  ;;  %p778_p0 = por %p777_p13, %p776_p12 }
  0x4b   :  { %584 = vmatpush3.bf16.msra.mxu1 %v650_v8  ;;  %p779_p1 = pnand %p778_p0, %p772_p11 }
  0x4c   :  { %585 = vmatprep.subr.bf16.mxu1 %v806_v0  ;;  %602 = vmatpush3.bf16.msra.mxu0 %v657_v15 }
  0x4d   :  { %603 = vmatprep.subr.bf16.mxu0 %v806_v0 }
  0x4f   :  { %586 = vmatpush3.bf16.msra.mxu1 %v651_v9 }
  0x50   :  { %587 = vmatprep.subr.bf16.mxu1 %v806_v0  ;;  %604 = vmatpush3.bf16.msra.mxu0 %v658_v16 }
  0x51   :  { %605 = vmatprep.subr.bf16.mxu0 %v806_v0 }
  0x53   :  { %588 = vmatpush3.bf16.msra.mxu1 %v652_v10 }
  0x54   :  { %589 = vmatprep.subr.bf16.mxu1 %v806_v0  ;;  %606 = vmatpush3.bf16.msra.mxu0 %v659_v17 }
  0x55   :  { %607 = vmatprep.subr.bf16.mxu0 %v806_v0 }
  0x57   :  { %590 = vmatpush3.bf16.msra.mxu1 %v653_v11 }
  0x58   :  { %591 = vmatprep.subr.bf16.mxu1 %v806_v0  ;;  %608 = vmatpush3.bf16.msra.mxu0 %v660_v18 }
  0x59   :  { %609 = vmatprep.subr.bf16.mxu0 %v806_v0 }
  0x5b   :  { %592 = vmatpush3.bf16.msra.mxu1 %v654_v12 }
  0x5c   :  { %617 = vmatprep.subr.bf16.mxu1 %v806_v0  ;;  %610 = vmatpush3.bf16.msra.mxu0 %v661_v27 }
  0x5d   :  { %611 = vmatprep.subr.bf16.mxu0 %v806_v0 }
  0x60   :  { %612 = vmatpush3.bf16.msra.mxu0 %v662_v28 }
 0x102   :  { %v150_v20 = vpop.f32.mrf.mxu0 }
 0x103   :  { %v151_v21 = vadd.f32 %v513_v19, %v150_v20 }
 0x104   :  { %v575_v22 = vpop.f32.mrf.mxu0 }
 0x105   :  { %v156_v23 = vmax.f32 %v151_v21, 0.0 }
 0x106   :  { %v153_v24 = vpop.f32.mrf.mxu0 }
 0x107   :  { %v157_v25 = vpack.c.bf16 %v156_v23, %v156_v23 }
 0x108   :  { %v576_v26 = vpop.f32.mrf.mxu0 }
 0x109   :  { %594 = vmatmul.mubr.bf16.vlgmr.msra.gmra.mxu1 %v157_v25 }
 0x10a   :  { %633 = vmatprep.mubr.msk.bf16.mxu1 %vm807_vm0, %v806_v0  ;;  %618 = vmatpush3.bf16.msra.mxu1 %v663_v29 }
 0x10b   :  { %619 = vmatprep.subr.bf16.mxu1 %v806_v0 }
 0x10e   :  { %620 = vmatpush3.bf16.msra.mxu1 %v664_v30 }
 0x10f   :  { %621 = vmatprep.subr.bf16.mxu1 %v806_v0 }
 0x112   :  { %622 = vmatpush3.bf16.msra.mxu1 %v665_v31 }
 0x113   :  { %623 = vmatprep.subr.bf16.mxu1 %v806_v0 }
 0x116   :  { %624 = vmatpush3.bf16.msra.mxu1 %v666_v32 }
 0x117   :  { %625 = vmatprep.subr.bf16.mxu1 %v806_v0 }
 0x11a   :  { %626 = vmatpush3.bf16.msra.mxu1 %v667_v33 }
 0x11b   :  { %627 = vmatprep.subr.bf16.mxu1 %v806_v0 }
 0x11e   :  { %628 = vmatpush3.bf16.msra.mxu1 %v668_v34 }
 0x11f   :  { %629 = vmatprep.subr.bf16.mxu1 %v806_v0 }
 0x122   :  { %630 = vmatpush3.bf16.msra.mxu1 %v669_v43 }
 0x123   :  { %631 = vmatprep.subr.bf16.mxu1 %v806_v0 }
 0x126   :  { %632 = vmatpush3.bf16.msra.mxu1 %v670_v44 }
 0x1c9   :  { %v263_v36 = vpop.f32.mrf.mxu1 }
 0x1ca   :  { %v264_v37 = vadd.f32 %v515_v35, %v263_v36 }
 0x1cb   :  { %v595_v38 = vpop.f32.mrf.mxu1 }
 0x1cc   :  { %v269_v39 = vmax.f32 %v264_v37, 0.0 }
 0x1cd   :  { %v266_v40 = vpop.f32.mrf.mxu1 }
 0x1ce   :  { %v270_v41 = vpack.c.bf16 %v269_v39, %v269_v39 }
 0x1cf   :  { %v596_v42 = vpop.f32.mrf.mxu1 }
 0x1d0   :  { %614 = vmatmul.mubr.bf16.vlgmr.msra.gmra.mxu0 %v270_v41 }
 0x290   :  { %v376_v46 = vpop.f32.mrf.mxu0 }
 0x291   :  { %v377_v47 = vadd.f32 %v524_v45, %v376_v46 }
 0x292   :  { %v615_v48 = vpop.f32.mrf.mxu0 }
 0x293   :  { %v382_v49 = vmax.f32 %v377_v47, 0.0 }
 0x294   :  { %v379_v50 = vpop.f32.mrf.mxu0 }
 0x295   :  { %v383_v51 = vpack.c.bf16 %v382_v49, %v382_v49 }
 0x296   :  { %v616_v52 = vpop.f32.mrf.mxu0 }
 0x297   :  { %634 = vmatmul.mubr.bf16.vlgmr.msra.gmra.mxu1 %v383_v51 }
 0x357   :  { %v489_v54 = vpop.f32.mrf.mxu1 }
 0x358   :  { %v490_v55 = vadd.f32 %v533_v53, %v489_v54 }
 0x359   :  { %v635_v56 = vpop.f32.mrf.mxu1 }
 0x35a   :  { %495 = vst [vmem:[#allocation11] sm:$0xff] %v490_v55 }
 0x35b   :  { %v492_v57 = vpop.f32.mrf.mxu1 }
 0x35c   :  { %782 = shalt.err (!%p779_p1)
}
 0x35d   :  { %505 = dma.vmem_to_hbm [thread:$0]  %s503_s17, 128, %s940_s9, [#allocation4]   ;;  %v636_v58 = vpop.f32.mrf.mxu1 }
 0x35e   :  { %797 = dma.done.wait [#allocation4], 128  }
 0x35f   :  { %798 = vsyncadd [#allocation4], 4294967168 }
 0x360   :  { %509 = vsyncpa [#allocation3], 1 }
 0x361   :  { %510 = vsyncpa [#allocation6], 1 }
 0x362   :  { %511 = vsyncpa [#allocation9], 1 }
 0x363   :  { %512 = vsyncpa [#allocation4], 1 }

</bundles_post_ra>
